<compile_context>
chip_gen: v5e
topology: v5e:2x2
jax: 0.10.0
libtpu: 0.0.40
codegen_flags: <defaults>
</compile_context>

<pallas_src>
import math

import jax
import jax.numpy as jnp
from jax.experimental import pallas as pl
from jax.experimental.pallas import tpu as pltpu

LANE = 128
SUBLANE = 8


def _spatial_attn_kernel(w_ref, x_ref, out_ref, f_ref):
    # w_ref  : SMEM (2,) f32        -- scalar-prefetched 1x1 conv weights [w_avg, w_max]
    # x_ref  : VMEM (GB, Cg, TS, 128)
    # out_ref: VMEM (GB, Cg, TS, 128)
    # f_ref  : VMEM (GB, TS, 128)   -- per-group attention map
    cg = x_ref.shape[1]
    w_avg = w_ref[0]
    w_max = w_ref[1]

    # Pass 1: streaming channel reduction (one (GB, TS, 128) slab live at a time,
    # f32 accumulation).  Keeps the live vreg set to a handful of vregs.
    x0 = x_ref[:, 0].astype(jnp.float32)
    acc_sum = x0
    acc_max = x0
    for c in range(1, cg):
        xc = x_ref[:, c].astype(jnp.float32)
        acc_sum = acc_sum + xc
        acc_max = jnp.maximum(acc_max, xc)

    # 1x1 conv over [avg, max] + sigmoid (EUP), hoisted once per block.
    f = jax.nn.sigmoid(w_avg * (acc_sum * jnp.float32(1.0 / cg)) + w_max * acc_max)
    f_ref[...] = f.astype(f_ref.dtype)

    # Pass 2: streaming per-channel scale + store (re-reads x from VMEM, cheap vld;
    # one unmasked vst per out vreg, cast only at the final store).
    for c in range(cg):
        out_ref[:, c] = (x_ref[:, c].astype(jnp.float32) * f).astype(out_ref.dtype)


def _tpu_tuning():
    """Per-generation budgets: total resident pipeline bytes, scoped VMEM limit, min grid steps."""
    try:
        vmem_bytes = int(pltpu.get_tpu_info().vmem_capacity_bytes)
    except Exception:
        vmem_bytes = 64 * 1024 * 1024  # conservative fallback (v7x-sized)
    if vmem_bytes <= 64 * 1024 * 1024:
        # v7x-like: 64 MiB VMEM per TC, 2 TensorCores -> smaller blocks, many grid steps.
        return dict(target_resident_bytes=8 * 1024 * 1024,
                    vmem_limit_bytes=32 * 1024 * 1024,
                    min_steps=8)
    # v5e / v6e: 128 MiB VMEM, single TC -> bigger blocks amortize per-step overhead.
    return dict(target_resident_bytes=16 * 1024 * 1024,
                vmem_limit_bytes=48 * 1024 * 1024,
                min_steps=2)


def _choose_tiles(n, cg, s, itemsize, *, target_resident_bytes, min_steps):
    """Pick (GB groups, TS spatial rows) per grid step.

    Budget counts the full resident set per step: input + output blocks (Cg
    channels each) plus the f block, all double-buffered (x2) by the pipeline.
    """
    per_row = 2 * (2 * cg + 1) * LANE * itemsize   # bytes per (group, 128-lane row)
    max_rows = max(1, target_resident_bytes // per_row)

    if s % SUBLANE != 0:                 # only for tiny spatial extents (s < 8)
        ts_candidates = [s]
    else:
        ts_candidates = [t for t in (256, 128, 64, 32, 16, 8) if s % t == 0]

    best, best_key = None, None
    for ts in ts_candidates:
        spatial_steps = s // ts
        gb = max(1, min(n, max_rows // max(ts, 1)))
        # keep >= min_steps total grid steps so the pipeline (and v7x megacore) stays fed
        gb = min(gb, max(1, (n * spatial_steps) // min_steps))
        while n % gb != 0:               # avoid ragged group blocks
            gb -= 1
        total_steps = (n // gb) * spatial_steps
        key = (total_steps >= min_steps, gb * ts <= max_rows, gb * ts)
        if best_key is None or key > best_key:
            best_key, best = key, (gb, ts)
    return best


def spatial_attention(x, conv_weight, num_groups=16):
    """x: (B, C, H, W), conv_weight: (1, 2, 1, 1) (Conv2d(2, 1, 1, bias=False)).

    Returns (X_z, F_i) with shapes (B, C, H, W) and (B, G, H, W),
    matching the PyTorch SpatialAttention forward.
    """
    B, C, H, W = x.shape
    G = math.gcd(C, num_groups)
    Cg = C // G
    HW = H * W
    N = B * G

    tuning = _tpu_tuning()

    S0 = pl.cdiv(HW, LANE)
    # Sublane-dense spatial tiles (S multiple of 8) when the spatial extent allows it.
    S = (-(-S0 // SUBLANE) * SUBLANE) if S0 >= SUBLANE else S0
    HW_pad = S * LANE

    GB, TS = _choose_tiles(N, Cg, S, jnp.dtype(x.dtype).itemsize,
                           target_resident_bytes=tuning["target_resident_bytes"],
                           min_steps=tuning["min_steps"])
    grid = (N // GB, S // TS)

    # (B, C, H, W) -> (N, Cg, HW) -> lane-aligned (N, Cg, S, 128).
    # NOTE: for ragged H*W the pad (and the slice below) each cost an extra HBM pass;
    # in a real model keep the padded layout persistent across layers instead.
    xg = x.reshape(N, Cg, HW)
    if HW_pad != HW:
        xg = jnp.pad(xg, ((0, 0), (0, 0), (0, HW_pad - HW)))
    xg = xg.reshape(N, Cg, S, LANE)

    w = conv_weight.reshape(2).astype(jnp.float32)     # [w_avg, w_max]

    out, f = pl.pallas_call(
        _spatial_attn_kernel,
        out_shape=(
            jax.ShapeDtypeStruct((N, Cg, S, LANE), x.dtype),
            jax.ShapeDtypeStruct((N, S, LANE), x.dtype),
        ),
        grid_spec=pltpu.PrefetchScalarGridSpec(
            num_scalar_prefetch=1,                      # conv weight lands in SMEM once
            grid=grid,
            in_specs=[
                pl.BlockSpec((GB, Cg, TS, LANE), lambda i, j, _w: (i, 0, j, 0)),
            ],
            out_specs=[
                pl.BlockSpec((GB, Cg, TS, LANE), lambda i, j, _w: (i, 0, j, 0)),
                pl.BlockSpec((GB, TS, LANE), lambda i, j, _w: (i, j, 0)),
            ],
        ),
        compiler_params=pltpu.CompilerParams(
            dimension_semantics=("parallel", "parallel"),
            vmem_limit_bytes=tuning["vmem_limit_bytes"],
        ),
    )(w, xg)

    out = out.reshape(N, Cg, HW_pad)
    f = f.reshape(N, HW_pad)
    if HW_pad != HW:
        out = out[:, :, :HW]
        f = f[:, :HW]
    X_z = out.reshape(B, C, H, W)
    F_i = f.reshape(B, G, H, W)
    return X_z, F_i


def _reference(x, conv_weight, num_groups=16):
    # Pure-JAX reference mirroring the PyTorch forward.
    B, C, H, W = x.shape
    G = math.gcd(C, num_groups)
    Cg = C // G
    q = x.reshape(B * G, Cg, H, W)
    avg = jnp.mean(q, axis=1, keepdims=True)
    mx = jnp.max(q, axis=1, keepdims=True)
    w = conv_weight.reshape(2)
    f = jax.nn.sigmoid(w[0] * avg + w[1] * mx)
    m = q * f
    return m.reshape(B, C, H, W), f.reshape(B, G, H, W)


def _run_case(key, B, C, H, W, num_groups=16):
    kx, kw = jax.random.split(key)
    x = jax.random.normal(kx, (B, C, H, W), dtype=jnp.float32)
    bound = 1.0 / math.sqrt(2.0)   # kaiming-uniform bound for Conv2d(2,1,1,bias=False)
    conv_weight = jax.random.uniform(
        kw, (1, 2, 1, 1), minval=-bound, maxval=bound, dtype=jnp.float32)

    X_z, F_i = spatial_attention(x, conv_weight, num_groups=num_groups)
    jax.block_until_ready((X_z, F_i))

    X_ref, F_ref = _reference(x, conv_weight, num_groups=num_groups)
    G = math.gcd(C, num_groups)
    assert X_z.shape == (B, C, H, W)
    assert F_i.shape == (B, G, H, W)
    assert jnp.allclose(X_z, X_ref, atol=1e-5, rtol=1e-5)
    assert jnp.allclose(F_i, F_ref, atol=1e-5, rtol=1e-5)


if __name__ == "__main__":
    key = jax.random.PRNGKey(0)
    k1, k2 = jax.random.split(key)

    # Case 1: B=2, C=32 (G=16, Cg=2), H=W=16 (HW=256, already a multiple of 128).
    _run_case(k1, B=2, C=32, H=16, W=16, num_groups=16)

    # Case 2: ragged spatial + odd group size: B=2, C=24 (G=8, Cg=3), H=W=10
    # (HW=100 -> padded to 128 inside the wrapper).
    _run_case(k2, B=2, C=24, H=10, W=10, num_groups=16)

    print("KERNEL_OK")
</pallas_src>

<mosaic_0001>
module attributes {stable_mosaic.version = 11 : i64} {
  func.func @_spatial_attn_kernel(%arg0: i32, %arg1: i32, %arg2: memref<2xf32, #tpu.memory_space<smem>>, %arg3: memref<4x2x2x128xf32, #tpu.memory_space<vmem>>, %arg4: memref<4x2x2x128xf32, #tpu.memory_space<vmem>>, %arg5: memref<4x2x128xf32, #tpu.memory_space<vmem>>) attributes {dimension_semantics = [#tpu.dimension_semantics<parallel>, #tpu.dimension_semantics<parallel>], iteration_bounds = array<i64: 8, 1>, scalar_prefetch = 1 : i64, scratch_operands = 0 : i64, tpu.core_type = #tpu.core_type<tc>, window_params = [{transform_indices = @transform_0, window_bounds = array<i64: 4, 2, 2, 128>}, {transform_indices = @transform_1, window_bounds = array<i64: 4, 2, 2, 128>}, {transform_indices = @transform_2, window_bounds = array<i64: 4, 2, 128>}]} {
    %c0 = arith.constant 0 : index
    %0 = memref.load %arg2[%c0] : memref<2xf32, #tpu.memory_space<smem>>
    %c1 = arith.constant 1 : index
    %1 = memref.load %arg2[%c1] : memref<2xf32, #tpu.memory_space<smem>>
    %c0_0 = arith.constant 0 : index
    %c0_1 = arith.constant 0 : index
    %c0_2 = arith.constant 0 : index
    %c0_3 = arith.constant 0 : index
    %2 = vector.load %arg3[%c0_0, %c0_1, %c0_2, %c0_3] : memref<4x2x2x128xf32, #tpu.memory_space<vmem>>, vector<4x1x2x128xf32>
    %3 = vector.shape_cast %2 : vector<4x1x2x128xf32> to vector<4x2x128xf32>
    %c0_4 = arith.constant 0 : index
    %c1_5 = arith.constant 1 : index
    %c0_6 = arith.constant 0 : index
    %c0_7 = arith.constant 0 : index
    %4 = vector.load %arg3[%c0_4, %c1_5, %c0_6, %c0_7] : memref<4x2x2x128xf32, #tpu.memory_space<vmem>>, vector<4x1x2x128xf32>
    %5 = vector.shape_cast %4 : vector<4x1x2x128xf32> to vector<4x2x128xf32>
    %6 = arith.addf %3, %5 : vector<4x2x128xf32>
    %7 = arith.maximumf %3, %5 : vector<4x2x128xf32>
    %cst = arith.constant 5.000000e-01 : f32
    %8 = vector.broadcast %cst : f32 to vector<4x2x128xf32>
    %9 = arith.mulf %6, %8 : vector<4x2x128xf32>
    %10 = vector.broadcast %0 : f32 to vector<4x2x128xf32>
    %11 = arith.mulf %10, %9 : vector<4x2x128xf32>
    %12 = vector.broadcast %1 : f32 to vector<4x2x128xf32>
    %13 = arith.mulf %12, %7 : vector<4x2x128xf32>
    %14 = arith.addf %11, %13 : vector<4x2x128xf32>
    %15 = arith.negf %14 : vector<4x2x128xf32>
    %16 = math.exp %15 : vector<4x2x128xf32>
    %cst_8 = arith.constant 1.000000e+00 : f32
    %17 = vector.broadcast %cst_8 : f32 to vector<4x2x128xf32>
    %18 = arith.addf %17, %16 : vector<4x2x128xf32>
    %19 = arith.divf %17, %18 : vector<4x2x128xf32>
    %c0_9 = arith.constant 0 : index
    %c0_10 = arith.constant 0 : index
    %c0_11 = arith.constant 0 : index
    %20 = vector.load %arg5[%c0_9, %c0_10, %c0_11] : memref<4x2x128xf32, #tpu.memory_space<vmem>>, vector<4x2x128xf32>
    tpu.vector_store %arg5[%c0_9, %c0_10, %c0_11], %19 {strides = array<i32>} : memref<4x2x128xf32, #tpu.memory_space<vmem>>, vector<4x2x128xf32>,
    %c0_12 = arith.constant 0 : index
    %c0_13 = arith.constant 0 : index
    %c0_14 = arith.constant 0 : index
    %c0_15 = arith.constant 0 : index
    %21 = vector.load %arg3[%c0_12, %c0_13, %c0_14, %c0_15] : memref<4x2x2x128xf32, #tpu.memory_space<vmem>>, vector<4x1x2x128xf32>
    %22 = vector.shape_cast %21 : vector<4x1x2x128xf32> to vector<4x2x128xf32>
    %23 = arith.mulf %22, %19 : vector<4x2x128xf32>
    %c0_16 = arith.constant 0 : index
    %c0_17 = arith.constant 0 : index
    %c0_18 = arith.constant 0 : index
    %c0_19 = arith.constant 0 : index
    %24 = vector.load %arg4[%c0_16, %c0_17, %c0_18, %c0_19] : memref<4x2x2x128xf32, #tpu.memory_space<vmem>>, vector<4x1x2x128xf32>
    %25 = vector.shape_cast %24 : vector<4x1x2x128xf32> to vector<4x2x128xf32>
    %26 = vector.shape_cast %23 : vector<4x2x128xf32> to vector<4x1x2x128xf32>
    tpu.vector_store %arg4[%c0_16, %c0_17, %c0_18, %c0_19], %26 {strides = array<i32>} : memref<4x2x2x128xf32, #tpu.memory_space<vmem>>, vector<4x1x2x128xf32>,
    %c0_20 = arith.constant 0 : index
    %c1_21 = arith.constant 1 : index
    %c0_22 = arith.constant 0 : index
    %c0_23 = arith.constant 0 : index
    %27 = vector.load %arg3[%c0_20, %c1_21, %c0_22, %c0_23] : memref<4x2x2x128xf32, #tpu.memory_space<vmem>>, vector<4x1x2x128xf32>
    %28 = vector.shape_cast %27 : vector<4x1x2x128xf32> to vector<4x2x128xf32>
    %29 = arith.mulf %28, %19 : vector<4x2x128xf32>
    %c0_24 = arith.constant 0 : index
    %c1_25 = arith.constant 1 : index
    %c0_26 = arith.constant 0 : index
    %c0_27 = arith.constant 0 : index
    %30 = vector.load %arg4[%c0_24, %c1_25, %c0_26, %c0_27] : memref<4x2x2x128xf32, #tpu.memory_space<vmem>>, vector<4x1x2x128xf32>
    %31 = vector.shape_cast %30 : vector<4x1x2x128xf32> to vector<4x2x128xf32>
    %32 = vector.shape_cast %29 : vector<4x2x128xf32> to vector<4x1x2x128xf32>
    tpu.vector_store %arg4[%c0_24, %c1_25, %c0_26, %c0_27], %32 {strides = array<i32>} : memref<4x2x2x128xf32, #tpu.memory_space<vmem>>, vector<4x1x2x128xf32>,
    return
  }
  func.func @transform_0(%arg0: i32, %arg1: i32, %arg2: memref<2xf32, #tpu.memory_space<smem>>) -> (i32, i32, i32, i32) {
    %c0_i32 = arith.constant 0 : i32
    %c0_i32_0 = arith.constant 0 : i32
    %c0_i32_1 = arith.constant 0 : i32
    return %arg0, %c0_i32, %arg1, %c0_i32_0 : i32, i32, i32, i32
  }
  func.func @transform_1(%arg0: i32, %arg1: i32, %arg2: memref<2xf32, #tpu.memory_space<smem>>) -> (i32, i32, i32, i32) {
    %c0_i32 = arith.constant 0 : i32
    %c0_i32_0 = arith.constant 0 : i32
    %c0_i32_1 = arith.constant 0 : i32
    return %arg0, %c0_i32, %arg1, %c0_i32_0 : i32, i32, i32, i32
  }
  func.func @transform_2(%arg0: i32, %arg1: i32, %arg2: memref<2xf32, #tpu.memory_space<smem>>) -> (i32, i32, i32) {
    %c0_i32 = arith.constant 0 : i32
    %c0_i32_0 = arith.constant 0 : i32
    return %arg0, %arg1, %c0_i32 : i32, i32, i32
  }
}

</mosaic_0001>

<bundles_post_ra>
// kernel: tpu_custom_call.1
= control target key start
LH: loop header
LB: loop body
LE: loop exit
PB: predicated region body
PF: predicated region fallthrough
CT: control target
= control target key end

     0   :  { %s801_s15 = smov [#allocation3]   ;;  %s1075_s0 = inlined_call_operand.hbm [shape: f32[2], index: 0, kind: input, shape index: {}]   ;;  %s1076_s1 = inlined_call_operand.hbm [shape: f32[32,2,2,128], index: 1, kind: input, shape index: {}]   ;;  %s1077_s2 = inlined_call_operand.hbm [shape: f32[32,2,2,128], index: 2, kind: output, shape index: {0}]   ;;  %s1078_s3 = inlined_call_operand.hbm [shape: f32[32,2,128], index: 3, kind: output, shape index: {1}]  }
   0x1   :  { %s10_s14 = sshll.u32 %s1075_s0, 4  ;;  %s11_s14 = int_to_ptr.hbm [resolvable:$true] %s10_s14 }
   0x2   :  { %13 = dma.hbm_to_smem %s11_s14, 16, %s801_s15, [#allocation2] }
   0x3   :  { %763 = dma.done.wait [#allocation2], 16 }
   0x4   :  { %764 = vsyncadd [#allocation2], 4294967280 }
   0x5   :  { %16 = sfence }
   0x6   :  { %17 = vsyncpa [#allocation5], 0 }
   0x7   :  { %19 = vsyncpa [#allocation5 + $0x1], 0 }
   0x8   :  { %20 = vsyncpa [#allocation6], 0 }
   0x9   :  { %22 = vsyncpa [#allocation6 + $0x1], 0 }
   0xa   :  { %23 = vsyncpa [#allocation9], 0 }
   0xb   :  { %25 = vsyncpa [#allocation9 + $0x1], 0  ;;  %s829_s16 = smov 0   ;;  %s831_s17 = smov 0  }
   0xc   :  { %s833_s18 = smov 0   ;;  %s835_s19 = smov 0  }
   0xd   :  { %s837_s0 = smov 0   ;;  %s839_s20 = smov 0  }
   0xe LB: > { %s510_s21 = sadd.s32 4294967295, %s799_s20   ;;  %s511_s22 = sadd.s32 4294967294, %s799_s20   ;;  %s799_s20 = sphi %s839_s20, %s31_s20   ;;  %s795_s0 = sphi %s837_s0, %s1103_s0   ;;  %s791_s19 = sphi %s835_s19, %s1102_s19   ;;  %s787_s18 = sphi %s833_s18, %s1101_s18   ;;  %s783_s17 = sphi %s831_s17, %s1100_s17   ;;  %s779_s16 = sphi %s829_s16, %s1099_s16  }
   0xf   : > { %s43_s23 = sadd.s32 1, %s795_s0  ;;  %s52_s24 = sadd.s32 1, %s787_s18 }
  0x10   : > { %p45_p0 = scmp.ge.s32.totalorder %s43_s23, 8  ;;  %p59_p1 = scmp.ne.s32.totalorder %s787_s18, %s783_s17 }
  0x11   : > { %p60_p2 = scmp.eq.s32.totalorder %s799_s20, 0  ;;  %p65_p3 = scmp.ne.s32.totalorder %s783_s17, %s779_s16 }
  0x12   : > { %s1105_s23 = smov (%p45_p0, %s43_s23), 0  ;;  %p66_p5 = scmp.eq.s32.totalorder %s510_s21, 0 }
  0x13   : > { %p870_p4 = por %p60_p2, %p59_p1  ;;  %s47_s26 = ssub.s32 %s795_s0, %s1105_s23 }
  0x14   : > { %p91_p6 = scmp.eq.s32.totalorder %s510_s21, 7  ;;  %p50_p7 = scmp.eq.s32.totalorder %s47_s26, 0 }
  0x15   : > { %p876_p8 = por %p66_p5, %p65_p3  ;;  %p97_p10 = scmp.eq.s32.totalorder %s511_s22, 7 }
  0x16   : > { %p880_p9 = por %p91_p6, %p59_p1  ;;  %p570_p12 = scmp.lt.s32.totalorder %s799_s20, 8 }
  0x17   : > { %s885_s29 = scalar_select %p50_p7, %s787_s18, %s52_s24  }
  0x18   : > { %p887_p11 = por %p97_p10, %p65_p3  ;;  %s145_s4 = sand.u32 1, %s787_s18  }
  0x19   : > { %s514_s5 = sshll.u32 %s145_s4, 4  ;;  %s549_s6 = sshll.u32 %s795_s0, 4 }
  0x1a   : > { %s156_s9 = scalar_lea.hbm %s1076_s1, %s549_s6  ;;  %s149_s10 = scalar_lea.vmem [#allocation4], %s514_s5 }
  0x1b   : > { %s159_s11 = sshll.u32 %s149_s10, 4  ;;  %s157_s12 = sshll.u32 %s156_s9, 4  ;;  %s160_s11 = int_to_ptr.vmem [resolvable:$true] %s159_s11  ;;  %s158_s12 = int_to_ptr.hbm [resolvable:$true] %s157_s12 }
  0x1c   : > { %p560_p13 = pnand %p570_p12, %p870_p4  ;;  %p518_p0 = scmp.ge.s32.totalorder %s799_s20, 1 }
  0x1d   : > { %s146_s13 = scalar_lea.sflag [#allocation5], %s145_s4  ;;  %s802_s14 = smov 32  }
  0x1e   : > { %s803_s15 = smov 2   ;;  %p167_p1 = scmp.lt.s32.totalorder %s799_s20, 9 }
  0x1f   : > { %562 = dma.hbm_to_vmem [thread:$0]  (!%p560_p13), %s158_s12, 256, %s160_s11, %s146_s13, %s802_s14, %s802_s14, %s803_s15  }
  0x20   : > { %p168_p2 = pnand %p518_p0, %p167_p1 }
  0x21   : > { %s902_s21 = sand.u32 (!%p168_p2), 1, %s783_s17  }
  0x22   : > { %171 = sbr.rel (%p168_p2) target bundleno = 107 (0x6b), region = 24  ;;  %s519_s22 = sshll.u32 (!%p168_p2), %s902_s21, 4 }
  0x23   : > { %s174_s24 = scalar_lea.sflag (!%p168_p2), [#allocation5], %s902_s21  ;;  %s908_s25 = scalar_lea.vmem (!%p168_p2), [#allocation4], %s519_s22 }
  0x27   : > { %766 = dma.done.wait (%p876_p8), %s174_s24, 256  }
  0x28   : > { %768 = vsyncadd (%p876_p8), %s174_s24, 4294967040  ;;  %s207_s26 = sld [smem:[#allocation3]]  ;;  %v209_v0 = vld [vmem:[%s908_s25] sm:$0x3]  ;;  %v523_v1 = vld [vmem:[%s908_s25 + $0x2] sm:$0x3] }
  0x29   : > { %s522_s4 = sld [smem:[#allocation3 + $0x1]]  ;;  %v210_v3 = vld [vmem:[%s908_s25 + $0x4] sm:$0x3]  ;;  %v218_v4 = vadd.f32 %v523_v1, %v209_v0  ;;  %v222_v5 = vmax.f32 %v209_v0, %v523_v1  ;;  %v524_v7 = vld [vmem:[%s908_s25 + $0x6] sm:$0x3]  ;;  %s521_s27 = sshll.u32 %s902_s21, 3 }
  0x2a   : > { %v211_v8 = vld [vmem:[%s908_s25 + $0x8] sm:$0x3]  ;;  %v525_v9 = vld [vmem:[%s908_s25 + $0xa] sm:$0x3]  ;;  %v219_v10 = vadd.f32 %v524_v7, %v210_v3  ;;  %v223_v11 = vmax.f32 %v210_v3, %v524_v7  ;;  %v212_v14 = vld [vmem:[%s908_s25 + $0xc] sm:$0x3] }
  0x2b   : > { %v220_v12 = vadd.f32 %v525_v9, %v211_v8  ;;  %v224_v13 = vmax.f32 %v211_v8, %v525_v9  ;;  %v526_v15 = vld [vmem:[%s908_s25 + $0xe] sm:$0x3]  ;;  %v226_v16 = vmul.f32 0.5, %v218_v4  ;;  %s966_s5 = scalar_lea.vmem [#allocation8], %s521_s27  ;;  %s551_s6 = sshll.u32 %s791_s19, 4 }
  0x2c   : > { %v221_v18 = vadd.f32 %v526_v15, %v212_v14  ;;  %v225_v19 = vmax.f32 %v212_v14, %v526_v15  ;;  %v227_v20 = vmul.f32 0.5, %v219_v10  ;;  %s552_s7 = sshll.u32 %s791_s19, 3  ;;  %s991_s8 = scalar_lea.vmem [#allocation7], %s519_s22 }
  0x2d   : > { %v228_v22 = vmul.f32 0.5, %v220_v12  ;;  %v324_v12 = vld [vmem:[%s908_s25] sm:$0x3]  ;;  %s387_s9 = sshll.u32 %s966_s5, 4  ;;  %s368_s11 = scalar_lea.hbm %s1077_s2, %s551_s6  ;;  %s1015_s9 = int_to_ptr.vmem [resolvable:$true] %s387_s9 }
  0x2e   : > { %v230_v2 = vstv %s207_s26  ;;  %v229_v25 = vmul.f32 0.5, %v221_v18  ;;  %s369_s12 = sshll.u32 %s991_s8, 4  ;;  %s386_s15 = scalar_lea.hbm %s1078_s3, %s552_s7  ;;  %s1018_s12 = int_to_ptr.vmem [resolvable:$true] %s369_s12 }
  0x2f   : > { %v235_v6 = vstv %s522_s4  ;;  %v231_v24 = vmul.f32 %v230_v2, %v226_v16  ;;  %v232_v27 = vmul.f32 %v230_v2, %v227_v20  ;;  %v233_v28 = vmul.f32 %v230_v2, %v228_v22  ;;  %v325_v16 = vld [vmem:[%s908_s25 + $0x4] sm:$0x3]  ;;  %s371_s22 = sshll.u32 %s368_s11, 4  ;;  %s389_s24 = sshll.u32 %s386_s15, 4  ;;  %s372_s22 = int_to_ptr.hbm [resolvable:$true] %s371_s22  ;;  %s1024_s24 = int_to_ptr.hbm [resolvable:$true] %s389_s24 }
  0x30   : > { %v236_v17 = vmul.f32 %v235_v6, %v222_v5  ;;  %v237_v21 = vmul.f32 %v235_v6, %v223_v11  ;;  %v238_v23 = vmul.f32 %v235_v6, %v224_v13  ;;  %v239_v26 = vmul.f32 %v235_v6, %v225_v19  ;;  %s697_s26 = sshra.s32 %s372_s22, 4  ;;  %s703_s6 = scalar_lea.hbm %s1077_s2, 128  ;;  %s698_s26 = int_to_ptr.hbm [resolvable:$true] %s697_s26 }
  0x31   : > { %v234_v30 = vmul.f32 %v230_v2, %v229_v25  ;;  %s699_s4 = scalar_lea.hbm %s698_s26, 16  ;;  %p704_p6 = scmp.lt.s32.totalorder %s698_s26, %s1077_s2 }
  0x32   : > { %v240_v29 = vadd.f32 %v236_v17, %v231_v24  ;;  %v241_v31 = vadd.f32 %v237_v21, %v232_v27  ;;  %v242_v32 = vadd.f32 %v238_v23, %v233_v28  ;;  %v326_v27 = vld [vmem:[%s908_s25 + $0x8] sm:$0x3]  ;;  %p700_p3 = scmp.ne.s32.totalorder %s698_s26, %s699_s4  ;;  %p705_p7 = scmp.lt.s32.totalorder %s703_s6, %s699_s4 }
  0x33   : > { %v243_v34 = vadd.f32 %v239_v26, %v234_v30 }
  0x34   : > { %v527_v33 = vmul.f32 -1.442695, %v240_v29  ;;  %v528_v35 = vmul.f32 -1.442695, %v241_v31  ;;  %v529_v36 = vmul.f32 -1.442695, %v242_v32  ;;  %p701_p4 = pnand %p700_p3, %p880_p9  ;;  %p706_p8 = por %p705_p7, %p704_p6 }
  0x35   : > { %v530_v37 = vmul.f32 -1.442695, %v243_v34  ;;  %v531_v31 = vld [vmem:[%s908_s25 + $0x2] sm:$0x3]  ;;  %v532_v34 = vld [vmem:[%s908_s25 + $0x6] sm:$0x3] }
  0x36   : > { %625 = vpow2.f32 %v527_v33  ;;  %v327_v33 = vld [vmem:[%s908_s25 + $0xc] sm:$0x3]  ;;  %p702_p5 = pneg %p701_p4 }
  0x37   : > { %627 = vpow2.f32 %v528_v35 }
  0x38   : > { %629 = vpow2.f32 %v529_v36  ;;  %p707_p10 = pnand %p706_p8, %p702_p5 }
  0x39   : > { %631 = vpow2.f32 %v530_v37  ;;  %v533_v37 = vld [vmem:[%s908_s25 + $0xa] sm:$0x3] }
  0x3c   : > { %v626_v38 = vpop.eup %625 }
  0x3d   : > { %v628_v39 = vpop.eup %627  ;;  %v256_v40 = vadd.f32 1.0, %v626_v38 }
  0x3e   : > { %v630_v41 = vpop.eup %629  ;;  %v257_v42 = vadd.f32 1.0, %v628_v39 }
  0x3f   : > { %v632_v43 = vpop.eup %631  ;;  %633 = vrcp.f32 %v256_v40  ;;  %v258_v44 = vadd.f32 1.0, %v630_v41  ;;  %v269_v46 = vand.u32 2147483647, %v256_v40  ;;  %v271_v47 = vand.u32 2147483648, %v256_v40  ;;  %v534_v41 = vld [vmem:[%s908_s25 + $0xe] sm:$0x3] }
  0x40   : > { %635 = vrcp.f32 %v257_v42  ;;  %v922_v45 = vadd.f32 1.0, %v632_v43  ;;  %v284_v49 = vand.u32 2147483647, %v257_v42  ;;  %v286_v50 = vand.u32 2147483648, %v257_v42  ;;  %s350_s25 = scalar_lea.sflag [#allocation6], %s902_s21 }
  0x41   : > { %637 = vrcp.f32 %v258_v44  ;;  %vm265_vm0 = vweird.f32 %v256_v40  ;;  %vm280_vm1 = vweird.f32 %v257_v42  ;;  %vm925_vm3 = vcmp.eq.f32.partialorder %v269_v46, 8.507059e+37 }
  0x42   : > { %639 = vrcp.f32 %v922_v45  ;;  %v272_v56 = vor.u32 1.1754944e-38, %v271_v47  ;;  %vm929_vm5 = vcmp.eq.f32.partialorder %v284_v49, 8.507059e+37  ;;  %v287_v60 = vor.u32 1.1754944e-38, %v286_v50 }
  0x43   : > { %vm295_vm6 = vweird.f32 %v258_v44  ;;  %v299_v0 = vand.u32 2147483647, %v258_v44  ;;  %v301_v3 = vand.u32 2147483648, %v258_v44  ;;  %vm310_vm8 = vweird.f32 %v922_v45 }
  0x44   : > { %v316_v8 = vand.u32 2147483648, %v922_v45  ;;  %v314_v11 = vand.u32 2147483647, %v922_v45 }
  0x45   : > { %v634_v48 = vpop.eup %633  ;;  %vm952_vm12 = vcmp.eq.f32.partialorder %v299_v0, 8.507059e+37  ;;  %v302_v20 = vor.u32 1.1754944e-38, %v301_v3 }
  0x46   : > { %v636_v51 = vpop.eup %635  ;;  %v261_v52 = vmul.f32 %v634_v48, %v256_v40  ;;  %vm266_vm2 = vweird.f32 %v634_v48  ;;  %v317_v25 = vor.u32 1.1754944e-38, %v316_v8  ;;  %vm981_vm15 = vcmp.eq.f32.partialorder %v314_v11, 8.507059e+37 }
  0x47   : > { %v276_v53 = vmul.f32 %v636_v51, %v257_v42  ;;  %v638_v57 = vpop.eup %637  ;;  %vm281_vm4 = vweird.f32 %v636_v51  ;;  %vm935_vm7 = vmor %vm265_vm0, %vm266_vm2 }
  0x48   : > { %v262_v54 = vsub.f32 1.0, %v261_v52  ;;  %v640_v61 = vpop.eup %639  ;;  %v291_v63 = vmul.f32 %v638_v57, %v258_v44  ;;  %vm943_vm9 = vmor %vm280_vm1, %vm281_vm4  ;;  %vm296_vm10 = vweird.f32 %v638_v57 }
  0x49   : > { %v277_v58 = vsub.f32 1.0, %v276_v53  ;;  %v306_v4 = vmul.f32 %v640_v61, %v922_v45  ;;  %vm311_vm11 = vweird.f32 %v640_v61  ;;  %vm962_vm13 = vmor %vm295_vm6, %vm296_vm10 }
  0x4a   : > { %v263_v62 = vmul.f32 %v634_v48, %v262_v54  ;;  %v292_v7 = vsub.f32 1.0, %v291_v63  ;;  %vm974_vm14 = vmor %vm310_vm8, %vm311_vm11 }
  0x4b   : > { %v278_v2 = vmul.f32 %v636_v51, %v277_v58  ;;  %v307_v10 = vsub.f32 1.0, %v306_v4 }
  0x4c   : > { %v264_v5 = vadd.f32 %v634_v48, %v263_v62  ;;  %v293_v14 = vmul.f32 %v638_v57, %v292_v7 }
  0x4d   : > { %v279_v9 = vadd.f32 %v636_v51, %v278_v2  ;;  %v308_v21 = vmul.f32 %v640_v61, %v307_v10 }
  0x4e   : > { %v268_v13 = vsel %vm935_vm7, %v634_v48, %v264_v5  ;;  %v294_v23 = vadd.f32 %v638_v57, %v293_v14 }
  0x4f   : > { %v273_v17 = vsel %vm925_vm3, %v272_v56, %v268_v13  ;;  %v283_v18 = vsel %vm943_vm9, %v636_v51, %v279_v9  ;;  %v309_v28 = vadd.f32 %v640_v61, %v308_v21 }
  0x50   : > { %320 = vst [vmem:[%s966_s5] sm:$0x3] %v273_v17  ;;  %v288_v22 = vsel %vm929_vm5, %v287_v60, %v283_v18  ;;  %v328_v26 = vmul.f32 %v324_v12, %v273_v17  ;;  %v298_v32 = vsel %vm962_vm13, %v638_v57, %v294_v23  ;;  %v340_v40 = vmul.f32 %v531_v31, %v273_v17 }
  0x51   : > { %321 = vst [vmem:[%s966_s5 + $0x2] sm:$0x3] %v288_v22  ;;  %v329_v30 = vmul.f32 %v325_v16, %v288_v22  ;;  %v303_v35 = vsel %vm952_vm12, %v302_v20, %v298_v32  ;;  %v313_v36 = vsel %vm974_vm14, %v640_v61, %v309_v28  ;;  %v341_v43 = vmul.f32 %v532_v34, %v288_v22 }
  0x52   : > { %332 = vst [vmem:[%s991_s8] sm:$0x3] %v328_v26  ;;  %v318_v38 = vsel %vm981_vm15, %v317_v25, %v313_v36  ;;  %v330_v39 = vmul.f32 %v326_v27, %v303_v35  ;;  %v342_v44 = vmul.f32 %v533_v37, %v303_v35 }
  0x53   : > { %333 = vst [vmem:[%s991_s8 + $0x4] sm:$0x3] %v329_v30  ;;  %v331_v42 = vmul.f32 %v327_v33, %v318_v38  ;;  %v343_v45 = vmul.f32 %v534_v41, %v318_v38 }
  0x54   : > { %322 = vst [vmem:[%s966_s5 + $0x4] sm:$0x3] %v303_v35 }
  0x55   : > { %323 = vst [vmem:[%s966_s5 + $0x6] sm:$0x3] %v318_v38 }
  0x56   : > { %334 = vst [vmem:[%s991_s8 + $0x8] sm:$0x3] %v330_v39 }
  0x57   : > { %335 = vst [vmem:[%s991_s8 + $0xc] sm:$0x3] %v331_v42 }
  0x58   : > { %535 = vst [vmem:[%s991_s8 + $0x2] sm:$0x3] %v340_v40 }
  0x59   : > { %536 = vst [vmem:[%s991_s8 + $0x6] sm:$0x3] %v341_v43 }
  0x5a   : > { %537 = vst [vmem:[%s991_s8 + $0xa] sm:$0x3] %v342_v44 }
  0x5b   : > { %538 = vst [vmem:[%s991_s8 + $0xe] sm:$0x3] %v343_v45 }
  0x5c   : > { %710 = shalt.err (!%p707_p10)
}
  0x5d   : > { %s804_s8 = smov 32   ;;  %s805_s10 = smov 2  }
  0x5e   : > { %555 = dma.vmem_to_hbm [thread:$0]  (%p880_p9), %s1018_s12, 256, %s372_s22, %s350_s25, %s804_s8, %s804_s8, %s805_s10  }
  0x5f   : > { %s355_s11 = scalar_lea.sflag [#allocation9], %s902_s21  ;;  %s725_s13 = sshra.s32 %s1024_s24, 4  ;;  %s726_s13 = int_to_ptr.hbm [resolvable:$true] %s725_s13 }
  0x60   : > { %s727_s14 = scalar_lea.hbm %s726_s13, 8  ;;  %s731_s4 = scalar_lea.hbm %s1078_s3, 64 }
  0x61   : > { %p728_p12 = scmp.ne.s32.totalorder %s726_s13, %s727_s14  ;;  %p732_p1 = scmp.lt.s32.totalorder %s726_s13, %s1078_s3 }
  0x62   : > { %p733_p2 = scmp.lt.s32.totalorder %s731_s4, %s727_s14 }
  0x63   : > { %p729_p13 = pnand %p728_p12, %p880_p9 }
  0x64   : > { %p734_p3 = por %p733_p2, %p732_p1 }
  0x65   : > { %p730_p0 = pneg %p729_p13 }
  0x67   : > { %p735_p4 = pnand %p734_p3, %p730_p0 }
  0x69   : > { %738 = shalt.err (!%p735_p4)
}
  0x6a   : > { %556 = dma.vmem_to_hbm [thread:$0]  (%p880_p9), %s1015_s9, 128, %s1024_s24, %s355_s11, %s804_s8, %s804_s8, %s805_s10  }
  0x6b PF: > { %p571_p5 = scmp.ge.s32.totalorder %s799_s20, 2  ;;  %s404_s21 = sand.u32 1, %s779_s16  }
  0x6c   : > { %s405_s12 = scalar_lea.sflag [#allocation6], %s404_s21 }
  0x6d   : > { %p564_p6 = pnand %p571_p5, %p887_p11 }
  0x6f   : > { %p565_p7 = pneg %p564_p6 }
  0x71   : > { %770 = dma.done.wait (%p565_p7), %s405_s12, 256  }
  0x72   : > { %772 = vsyncadd (%p565_p7), %s405_s12, 4294967040  ;;  %s415_s22 = scalar_lea.sflag [#allocation9], %s404_s21 }
  0x73   : > { %774 = dma.done.wait (%p565_p7), %s415_s22, 128  }
  0x74   : > { %776 = vsyncadd (%p565_p7), %s415_s22, 4294967168  ;;  %s31_s20 = sadd.s32 1, %s799_s20   ;;  %s1099_s16 = smov %s783_s17 }
  0x75   : > { %p28_p8 = scmp.ge.s32.totalorder %s31_s20, 10   ;;  %s1100_s17 = smov %s787_s18 }
  0x76   : > { %s1101_s18 = smov %s885_s29  ;;  %s1102_s19 = smov %s795_s0 }
  0x77   : > { %s1103_s0 = smov %s1105_s23  ;;  %30 = sbr.rel (!%p28_p8) target bundleno = 14 (0xe), region = 88 }
  0x7c   :  { %421 = vsyncpa [#allocation5], 1 }
  0x7d   :  { %423 = vsyncpa [#allocation5 + $0x1], 1 }
  0x7e   :  { %424 = vsyncpa [#allocation6], 1 }
  0x7f   :  { %426 = vsyncpa [#allocation6 + $0x1], 1 }
  0x80   :  { %427 = vsyncpa [#allocation9], 1 }
  0x81   :  { %429 = vsyncpa [#allocation9 + $0x1], 1 }

</bundles_post_ra>
